<compile_context>
chip_gen: v7x
topology: tpu7x:2x2x1
jax: 0.10.0
libtpu: 0.0.40
codegen_flags: <defaults>
</compile_context>

<pallas_src>
import functools

import jax
import jax.numpy as jnp
from jax import lax
from jax.experimental import pallas as pl
from jax.experimental.pallas import tpu as pltpu

LANE = 128
# Combined per-step HBM bytes for both input streams.  2 MiB -> <= 1 MiB per
# input block; double-buffered inputs + in-kernel f32 temporaries stay well
# inside v5e's 16 MiB scoped default and v7x's 64 MiB physical VMEM.
_TARGET_BLOCK_BYTES = 2 * 1024 * 1024


def _sublane_pack(dtype):
    """Sublane packing multiple for an HBM dtype (8 / 16 / 32 for 32/16/8-bit)."""
    return {4: 8, 2: 16, 1: 32}.get(jnp.dtype(dtype).itemsize, 8)


def _tversky_kernel(x_ref, t_ref, tp_ref, sp_ref, sr_ref, *,
                    ts, kk_half, s_total, ragged):
    """grid = (core_split, batch_blocks, chunks); chunk axis is the reduction."""
    k = pl.program_id(2)

    @pl.when(k == 0)
    def _():
        tp_ref[...] = jnp.zeros_like(tp_ref)
        sp_ref[...] = jnp.zeros_like(sp_ref)
        sr_ref[...] = jnp.zeros_like(sr_ref)

    prob = x_ref[...].astype(jnp.float32)   # (tb, ts, 128)
    ref = t_ref[...].astype(jnp.float32)

    if ragged:
        # Zero out sublane rows past the real extent of the sample (covers a
        # partial last chunk and, for the 2-way core split, a duplicated
        # clamped chunk).  Exact because out-of-range rows contribute 0.
        chunk = pl.program_id(0) * kk_half + k
        row = chunk * ts + lax.broadcasted_iota(jnp.int32, prob.shape, 1)
        valid = row < s_total
        prob = jnp.where(valid, prob, 0.0)
        ref = jnp.where(valid, ref, 0.0)

    # Per-lane partial sums: one VPU multiply + three sublane reduces.
    tp_ref[...] += jnp.sum(ref * prob, axis=1)   # (tb, 128)
    sp_ref[...] += jnp.sum(prob, axis=1)
    sr_ref[...] += jnp.sum(ref, axis=1)


def tversky_loss(inp, target, beta=0.3):
    """Pallas implementation of TverskyLoss.forward(input, target, beta)."""
    assert inp.shape == target.shape
    batch = inp.shape[0]
    alpha = 1.0 - beta
    # The in-kernel simplification tp + alpha*fp + beta*fn == alpha*sp + beta*sr
    # requires alpha + beta == 1 (always true with alpha = 1 - beta).
    assert abs((alpha + beta) - 1.0) < 1e-6

    n = 1
    for d in inp.shape[1:]:
        n *= d

    def _flat(a):
        a = a.reshape(batch, n)                 # free bitcast reshape
        rem = (-n) % LANE
        if rem:
            # Rare path (sample size not a multiple of 128): one pad copy.
            # TODO(synk): could be avoided with flat 2D blocks + lane masking,
            # at the cost of poor vreg/sublane occupancy for tb == 1.
            a = jnp.pad(a, ((0, 0), (0, rem)))
        return a.reshape(batch, -1, LANE)       # free bitcast reshape

    x = _flat(inp)
    t = _flat(target)
    s = x.shape[1]                              # sublane rows per sample

    pack = max(_sublane_pack(x.dtype), _sublane_pack(t.dtype))
    bytes_per_row = LANE * (jnp.dtype(x.dtype).itemsize +
                            jnp.dtype(t.dtype).itemsize)
    target_rows = max(pack, _TARGET_BLOCK_BYTES // bytes_per_row)

    if s > target_rows:
        # Large samples: one sample per batch block, tile the reduction axis.
        tb = 1
        ts = (target_rows // pack) * pack
    else:
        # Small samples: whole sample per chunk; pack several samples per
        # block, but keep >= 2 batch blocks when batch >= 2 so both v7x
        # TensorCores get work via the "parallel" batch axis.
        ts = s
        tb = max(1, min(batch, target_rows // max(ts, 1)))
        if batch >= 2:
            tb = min(tb, -(-batch // 2))
        nb = -(-batch // tb)
        tb = -(-batch // nb)                    # balanced batch blocks

    gb = -(-batch // tb)
    kk = -(-s // ts)
    # 2-way split of the reduction axis when the batch axis alone cannot feed
    # both v7x cores (no effect on single-TC v5e/v6e beyond one tiny block).
    ncs = 2 if (gb == 1 and kk >= 2) else 1
    kk_half = -(-kk // ncs)
    ragged = (ncs * kk_half * ts) != s

    if ncs * kk_half == kk:
        in_map = lambda c, b, k: (b, c * kk_half + k, 0)
    else:
        # Clamp the (single) over-the-end chunk; the kernel mask zeroes it.
        in_map = lambda c, b, k: (b, jnp.minimum(c * kk_half + k, kk - 1), 0)

    kernel = functools.partial(_tversky_kernel, ts=ts, kk_half=kk_half,
                               s_total=s, ragged=ragged)

    acc_shape = jax.ShapeDtypeStruct((ncs, gb, tb, LANE), jnp.float32)
    acc_spec = pl.BlockSpec((pl.Squeezed(), pl.Squeezed(), tb, LANE),
                            lambda c, b, k: (c, b, 0, 0))

    tp, sp, sr = pl.pallas_call(
        kernel,
        out_shape=(acc_shape, acc_shape, acc_shape),
        grid_spec=pltpu.PrefetchScalarGridSpec(
            num_scalar_prefetch=0,
            grid=(ncs, gb, kk_half),
            in_specs=[
                pl.BlockSpec((tb, ts, LANE), in_map),
                pl.BlockSpec((tb, ts, LANE), in_map),
            ],
            out_specs=(acc_spec, acc_spec, acc_spec),
        ),
        compiler_params=pltpu.CompilerParams(
            dimension_semantics=("parallel", "parallel", "arbitrary"),
            vmem_limit_bytes=32 * 1024 * 1024,
        ),
    )(x, t)

    # Finalize on tiny vectors: combine core-split partials + lane reduce,
    # slice away padded batch rows BEFORE dividing so they never produce NaN.
    # (A real all-zero sample still yields 0/0 = NaN, matching the reference.)
    def _tot(a):
        return jnp.sum(a, axis=(0, 3)).reshape(gb * tb)[:batch]

    tp_s, sp_s, sr_s = _tot(tp), _tot(sp), _tot(sr)
    loss_i = 1.0 - tp_s / (alpha * sp_s + beta * sr_s)
    return jnp.sum(loss_i) / batch


def _reference_loss(inp, target, beta=0.3):
    """Pure-JAX replica of the PyTorch forward, for correctness checking."""
    alpha = 1.0 - beta
    batch = inp.shape[0]
    loss = 0.0
    for i in range(batch):
        prob = inp[i].astype(jnp.float32)
        ref = target[i].astype(jnp.float32)
        tp = jnp.sum(ref * prob)
        fp = jnp.sum((1.0 - ref) * prob)
        fn = jnp.sum(ref * (1.0 - prob))
        tversky = tp / (tp + alpha * fp + beta * fn)
        loss = loss + (1.0 - tversky)
    return loss / batch


if __name__ == "__main__":
    key = jax.random.PRNGKey(0)
    k1, k2, k3, k4 = jax.random.split(key, 4)

    # Primary check: NCHW probability map + binary mask, both f32.
    B, C, H, W = 2, 4, 16, 16
    inp = jax.nn.sigmoid(jax.random.normal(k1, (B, C, H, W), dtype=jnp.float32))
    target = (jax.random.uniform(k2, (B, C, H, W)) > 0.5).astype(jnp.float32)

    loss = jax.block_until_ready(tversky_loss(inp, target, beta=0.3))
    ref = jax.block_until_ready(_reference_loss(inp, target, beta=0.3))
    assert jnp.allclose(loss, ref, rtol=1e-4, atol=1e-5), (loss, ref)

    # Narrow HBM dtype for the mask (kernel casts to f32 internally).
    loss_u8 = jax.block_until_ready(
        tversky_loss(inp, target.astype(jnp.uint8), beta=0.3))
    assert jnp.allclose(loss_u8, ref, rtol=1e-4, atol=1e-5), (loss_u8, ref)

    # Non-128-aligned sample size + odd batch (lane-pad / partial-block path).
    inp2 = jax.nn.sigmoid(jax.random.normal(k3, (3, 3, 5, 7), dtype=jnp.float32))
    tgt2 = (jax.random.uniform(k4, (3, 3, 5, 7)) > 0.5).astype(jnp.float32)
    loss2 = jax.block_until_ready(tversky_loss(inp2, tgt2, beta=0.3))
    ref2 = jax.block_until_ready(_reference_loss(inp2, tgt2, beta=0.3))
    assert jnp.allclose(loss2, ref2, rtol=1e-4, atol=1e-5), (loss2, ref2)

    print("KERNEL_OK")
</pallas_src>

<mosaic_0001>
module attributes {stable_mosaic.version = 11 : i64} {
  func.func @_tversky_kernel(%arg0: i32, %arg1: i32, %arg2: i32, %arg3: memref<1x8x128xf32, #tpu.memory_space<vmem>>, %arg4: memref<1x8x128xf32, #tpu.memory_space<vmem>>, %arg5: memref<1x1x1x128xf32, #tpu.memory_space<vmem>>, %arg6: memref<1x1x1x128xf32, #tpu.memory_space<vmem>>, %arg7: memref<1x1x1x128xf32, #tpu.memory_space<vmem>>) attributes {dimension_semantics = [#tpu.dimension_semantics<parallel>, #tpu.dimension_semantics<parallel>, #tpu.dimension_semantics<arbitrary>], iteration_bounds = array<i64: 1, 2, 1>, scalar_prefetch = 0 : i64, scratch_operands = 0 : i64, tpu.core_type = #tpu.core_type<tc>, window_params = [{transform_indices = @transform_0, window_bounds = array<i64: 1, 8, 128>}, {transform_indices = @transform_1, window_bounds = array<i64: 1, 8, 128>}, {transform_indices = @transform_2, window_bounds = array<i64: 1, 1, 1, 128>}, {transform_indices = @transform_3, window_bounds = array<i64: 1, 1, 1, 128>}, {transform_indices = @transform_4, window_bounds = array<i64: 1, 1, 1, 128>}]} {
    %c0_i32 = arith.constant 0 : i32
    %0 = arith.cmpi eq, %arg2, %c0_i32 : i32
    %1 = arith.extui %0 : i1 to i32
    %c0_i32_0 = arith.constant 0 : i32
    %2 = arith.cmpi ne, %1, %c0_i32_0 : i32
    scf.if %2 {
      %cst_32 = arith.constant 0.000000e+00 : f32
      %27 = vector.broadcast %cst_32 : f32 to vector<1x128xf32>
      %c0_33 = arith.constant 0 : index
      %c0_34 = arith.constant 0 : index
      %c0_35 = arith.constant 0 : index
      %c0_36 = arith.constant 0 : index
      %28 = vector.load %arg5[%c0_33, %c0_34, %c0_35, %c0_36] : memref<1x1x1x128xf32, #tpu.memory_space<vmem>>, vector<1x1x1x128xf32>
      %29 = vector.shape_cast %28 : vector<1x1x1x128xf32> to vector<1x128xf32>
      %30 = vector.shape_cast %27 : vector<1x128xf32> to vector<1x1x1x128xf32>
      tpu.vector_store %arg5[%c0_33, %c0_34, %c0_35, %c0_36], %30 {strides = array<i32>} : memref<1x1x1x128xf32, #tpu.memory_space<vmem>>, vector<1x1x1x128xf32>,
      %cst_37 = arith.constant 0.000000e+00 : f32
      %31 = vector.broadcast %cst_37 : f32 to vector<1x128xf32>
      %c0_38 = arith.constant 0 : index
      %c0_39 = arith.constant 0 : index
      %c0_40 = arith.constant 0 : index
      %c0_41 = arith.constant 0 : index
      %32 = vector.load %arg6[%c0_38, %c0_39, %c0_40, %c0_41] : memref<1x1x1x128xf32, #tpu.memory_space<vmem>>, vector<1x1x1x128xf32>
      %33 = vector.shape_cast %32 : vector<1x1x1x128xf32> to vector<1x128xf32>
      %34 = vector.shape_cast %31 : vector<1x128xf32> to vector<1x1x1x128xf32>
      tpu.vector_store %arg6[%c0_38, %c0_39, %c0_40, %c0_41], %34 {strides = array<i32>} : memref<1x1x1x128xf32, #tpu.memory_space<vmem>>, vector<1x1x1x128xf32>,
      %cst_42 = arith.constant 0.000000e+00 : f32
      %35 = vector.broadcast %cst_42 : f32 to vector<1x128xf32>
      %c0_43 = arith.constant 0 : index
      %c0_44 = arith.constant 0 : index
      %c0_45 = arith.constant 0 : index
      %c0_46 = arith.constant 0 : index
      %36 = vector.load %arg7[%c0_43, %c0_44, %c0_45, %c0_46] : memref<1x1x1x128xf32, #tpu.memory_space<vmem>>, vector<1x1x1x128xf32>
      %37 = vector.shape_cast %36 : vector<1x1x1x128xf32> to vector<1x128xf32>
      %38 = vector.shape_cast %35 : vector<1x128xf32> to vector<1x1x1x128xf32>
      tpu.vector_store %arg7[%c0_43, %c0_44, %c0_45, %c0_46], %38 {strides = array<i32>} : memref<1x1x1x128xf32, #tpu.memory_space<vmem>>, vector<1x1x1x128xf32>,
    } else {
    }
    %c0 = arith.constant 0 : index
    %c0_1 = arith.constant 0 : index
    %c0_2 = arith.constant 0 : index
    %3 = vector.load %arg3[%c0, %c0_1, %c0_2] : memref<1x8x128xf32, #tpu.memory_space<vmem>>, vector<1x8x128xf32>
    %c0_3 = arith.constant 0 : index
    %c0_4 = arith.constant 0 : index
    %c0_5 = arith.constant 0 : index
    %4 = vector.load %arg4[%c0_3, %c0_4, %c0_5] : memref<1x8x128xf32, #tpu.memory_space<vmem>>, vector<1x8x128xf32>
    %c0_6 = arith.constant 0 : index
    %c0_7 = arith.constant 0 : index
    %c0_8 = arith.constant 0 : index
    %c0_9 = arith.constant 0 : index
    %5 = vector.load %arg5[%c0_6, %c0_7, %c0_8, %c0_9] : memref<1x1x1x128xf32, #tpu.memory_space<vmem>>, vector<1x1x1x128xf32>
    %6 = vector.shape_cast %5 : vector<1x1x1x128xf32> to vector<1x128xf32>
    %7 = arith.mulf %4, %3 : vector<1x8x128xf32>
    %cst = arith.constant dense<0.000000e+00> : vector<1x128xf32>
    %8 = vector.multi_reduction <add>, %7, %cst [1] : vector<1x8x128xf32> to vector<1x128xf32>
    %9 = arith.addf %6, %8 : vector<1x128xf32>
    %c0_10 = arith.constant 0 : index
    %c0_11 = arith.constant 0 : index
    %c0_12 = arith.constant 0 : index
    %c0_13 = arith.constant 0 : index
    %10 = vector.load %arg5[%c0_10, %c0_11, %c0_12, %c0_13] : memref<1x1x1x128xf32, #tpu.memory_space<vmem>>, vector<1x1x1x128xf32>
    %11 = vector.shape_cast %10 : vector<1x1x1x128xf32> to vector<1x128xf32>
    %12 = vector.shape_cast %9 : vector<1x128xf32> to vector<1x1x1x128xf32>
    tpu.vector_store %arg5[%c0_10, %c0_11, %c0_12, %c0_13], %12 {strides = array<i32>} : memref<1x1x1x128xf32, #tpu.memory_space<vmem>>, vector<1x1x1x128xf32>,
    %c0_14 = arith.constant 0 : index
    %c0_15 = arith.constant 0 : index
    %c0_16 = arith.constant 0 : index
    %c0_17 = arith.constant 0 : index
    %13 = vector.load %arg6[%c0_14, %c0_15, %c0_16, %c0_17] : memref<1x1x1x128xf32, #tpu.memory_space<vmem>>, vector<1x1x1x128xf32>
    %14 = vector.shape_cast %13 : vector<1x1x1x128xf32> to vector<1x128xf32>
    %cst_18 = arith.constant dense<0.000000e+00> : vector<1x128xf32>
    %15 = vector.multi_reduction <add>, %3, %cst_18 [1] : vector<1x8x128xf32> to vector<1x128xf32>
    %16 = arith.addf %14, %15 : vector<1x128xf32>
    %c0_19 = arith.constant 0 : index
    %c0_20 = arith.constant 0 : index
    %c0_21 = arith.constant 0 : index
    %c0_22 = arith.constant 0 : index
    %17 = vector.load %arg6[%c0_19, %c0_20, %c0_21, %c0_22] : memref<1x1x1x128xf32, #tpu.memory_space<vmem>>, vector<1x1x1x128xf32>
    %18 = vector.shape_cast %17 : vector<1x1x1x128xf32> to vector<1x128xf32>
    %19 = vector.shape_cast %16 : vector<1x128xf32> to vector<1x1x1x128xf32>
    tpu.vector_store %arg6[%c0_19, %c0_20, %c0_21, %c0_22], %19 {strides = array<i32>} : memref<1x1x1x128xf32, #tpu.memory_space<vmem>>, vector<1x1x1x128xf32>,
    %c0_23 = arith.constant 0 : index
    %c0_24 = arith.constant 0 : index
    %c0_25 = arith.constant 0 : index
    %c0_26 = arith.constant 0 : index
    %20 = vector.load %arg7[%c0_23, %c0_24, %c0_25, %c0_26] : memref<1x1x1x128xf32, #tpu.memory_space<vmem>>, vector<1x1x1x128xf32>
    %21 = vector.shape_cast %20 : vector<1x1x1x128xf32> to vector<1x128xf32>
    %cst_27 = arith.constant dense<0.000000e+00> : vector<1x128xf32>
    %22 = vector.multi_reduction <add>, %4, %cst_27 [1] : vector<1x8x128xf32> to vector<1x128xf32>
    %23 = arith.addf %21, %22 : vector<1x128xf32>
    %c0_28 = arith.constant 0 : index
    %c0_29 = arith.constant 0 : index
    %c0_30 = arith.constant 0 : index
    %c0_31 = arith.constant 0 : index
    %24 = vector.load %arg7[%c0_28, %c0_29, %c0_30, %c0_31] : memref<1x1x1x128xf32, #tpu.memory_space<vmem>>, vector<1x1x1x128xf32>
    %25 = vector.shape_cast %24 : vector<1x1x1x128xf32> to vector<1x128xf32>
    %26 = vector.shape_cast %23 : vector<1x128xf32> to vector<1x1x1x128xf32>
    tpu.vector_store %arg7[%c0_28, %c0_29, %c0_30, %c0_31], %26 {strides = array<i32>} : memref<1x1x1x128xf32, #tpu.memory_space<vmem>>, vector<1x1x1x128xf32>,
    return
  }
  func.func @transform_0(%arg0: i32, %arg1: i32, %arg2: i32) -> (i32, i32, i32) {
    %c1_i32 = arith.constant 1 : i32
    %0 = arith.muli %arg0, %c1_i32 : i32
    %1 = arith.addi %0, %arg2 : i32
    %c0_i32 = arith.constant 0 : i32
    %c0_i32_0 = arith.constant 0 : i32
    return %arg1, %1, %c0_i32 : i32, i32, i32
  }
  func.func @transform_1(%arg0: i32, %arg1: i32, %arg2: i32) -> (i32, i32, i32) {
    %c1_i32 = arith.constant 1 : i32
    %0 = arith.muli %arg0, %c1_i32 : i32
    %1 = arith.addi %0, %arg2 : i32
    %c0_i32 = arith.constant 0 : i32
    %c0_i32_0 = arith.constant 0 : i32
    return %arg1, %1, %c0_i32 : i32, i32, i32
  }
  func.func @transform_2(%arg0: i32, %arg1: i32, %arg2: i32) -> (i32, i32, i32, i32) {
    %c0_i32 = arith.constant 0 : i32
    %c0_i32_0 = arith.constant 0 : i32
    %c0_i32_1 = arith.constant 0 : i32
    return %arg0, %arg1, %c0_i32, %c0_i32_0 : i32, i32, i32, i32
  }
  func.func @transform_3(%arg0: i32, %arg1: i32, %arg2: i32) -> (i32, i32, i32, i32) {
    %c0_i32 = arith.constant 0 : i32
    %c0_i32_0 = arith.constant 0 : i32
    %c0_i32_1 = arith.constant 0 : i32
    return %arg0, %arg1, %c0_i32, %c0_i32_0 : i32, i32, i32, i32
  }
  func.func @transform_4(%arg0: i32, %arg1: i32, %arg2: i32) -> (i32, i32, i32, i32) {
    %c0_i32 = arith.constant 0 : i32
    %c0_i32_0 = arith.constant 0 : i32
    %c0_i32_1 = arith.constant 0 : i32
    return %arg0, %arg1, %c0_i32, %c0_i32_0 : i32, i32, i32, i32
  }
}

</mosaic_0001>

<bundles_post_ra>
// kernel: tpu_custom_call.1
= control target key start
LH: loop header
LB: loop body
LE: loop exit
PB: predicated region body
PF: predicated region fallthrough
CT: control target
= control target key end

     0   :  { %s1200_s0 = inlined_call_operand.hbm [shape: f32[2,8,128], index: 0, kind: input, shape index: {}]   ;;  %s1201_s1 = inlined_call_operand.hbm [shape: f32[2,8,128], index: 1, kind: input, shape index: {}]   ;;  %s1202_s2 = inlined_call_operand.hbm [shape: f32[1,2,1,128], index: 2, kind: output, shape index: {0}]   ;;  %s1203_s3 = inlined_call_operand.hbm [shape: f32[1,2,1,128], index: 3, kind: output, shape index: {1}]   ;;  %s1204_s4 = inlined_call_operand.hbm [shape: f32[1,2,1,128], index: 4, kind: output, shape index: {2}]  }
   0x1   :  { %1208 = sst [smem:[#allocation15_spill]] %s1200_s0 }
   0x2   :  { %10 = vsyncpa [#allocation3], 0 }
   0x3   :  { %12 = vsyncpa [#allocation3 + $0x1], 0 }
   0x4   :  { %13 = vsyncpa [#allocation6], 0 }
   0x5   :  { %15 = vsyncpa [#allocation6 + $0x1], 0 }
   0x6   :  { %16 = vsyncpa [#allocation4], 0 }
   0x7   :  { %18 = vsyncpa [#allocation4 + $0x1], 0 }
   0x8   :  { %19 = vsyncpa [#allocation9], 0 }
   0x9   :  { %21 = vsyncpa [#allocation9 + $0x1], 0  ;;  %s890_s15 = smov 0   ;;  %s892_s16 = smov 0  }
   0xa   :  { %s894_s17 = smov 0   ;;  %s896_s18 = smov 0  }
   0xb   :  { %s898_s19 = smov 0   ;;  %s900_s20 = smov 0  }
   0xc LB: > { %s921_s21 = sadd.s32 4294967295, %s857_s20   ;;  %s1205_s22 = sadd.s32 4294967294, %s857_s20   ;;  %s857_s20 = sphi %s900_s20, %s27_s20   ;;  %s853_s19 = sphi %s898_s19, %s1228_s19   ;;  %s849_s18 = sphi %s896_s18, %s1227_s18   ;;  %s845_s17 = sphi %s894_s17, %s1226_s17   ;;  %s841_s16 = sphi %s892_s16, %s1225_s16   ;;  %s837_s15 = sphi %s890_s15, %s1224_s15  }
   0xd   : > { %s42_s23 = sadd.s32 1, %s853_s19  ;;  %s57_s24 = sadd.s32 1, %s845_s17 }
   0xe   : > { %p44_p0 = scmp.ge.s32.totalorder %s42_s23, 2  ;;  %p64_p1 = scmp.ne.s32.totalorder %s845_s17, %s841_s16 }
   0xf   : > { %p65_p2 = scmp.eq.s32.totalorder %s857_s20, 0  ;;  %p70_p3 = scmp.ne.s32.totalorder %s841_s16, %s837_s15 }
  0x10   : > { %s1230_s23 = smov (%p44_p0, %s42_s23), 0  ;;  %p71_p5 = scmp.eq.s32.totalorder %s921_s21, 0 }
  0x11   : > { %p933_p4 = por %p65_p2, %p64_p1  ;;  %s52_s26 = ssub.s32 %s853_s19, %s1230_s23 }
  0x12   : > { %p126_p6 = scmp.eq.s32.totalorder %s921_s21, 1  ;;  %p55_p7 = scmp.eq.s32.totalorder %s52_s26, 0 }
  0x13   : > { %p941_p8 = por %p71_p5, %p70_p3  ;;  %p132_p10 = scmp.eq.s32.totalorder %s1205_s22, 1 }
  0x14   : > { %p945_p9 = por %p126_p6, %p64_p1  ;;  %p600_p13 = scmp.lt.s32.totalorder %s857_s20, 2 }
  0x15   : > { %s1210_s27 = scalar_select %p941_p8, 1, 0 }
  0x16   : > { %s1211_s28 = scalar_select %p945_p9, 1, 0 }
  0x17   : > { %s952_s29 = scalar_select %p55_p7, %s845_s17, %s57_s24  }
  0x18   : > { %p954_p11 = por %p132_p10, %p70_p3  ;;  %s961_s5 = sand.u32 1, %s845_s17  }
  0x19   : > { %s561_s6 = sshll.u32 %s961_s5, 3  ;;  %s562_s7 = sshll.u32 %s853_s19, 7 }
  0x1a   : > { %s1212_s30 = scalar_select %p954_p11, 1, 0 }
  0x1b   : > { %s1213_s0 = sld [smem:[#allocation15_spill]]  ;;  %s212_s11 = scalar_lea.vmem [#allocation2], %s561_s6 }
  0x1c   : > { %s221_s12 = sshll.u32 %s212_s11, 4  ;;  %p978_p0 = pnand %p600_p13, %p933_p4  ;;  %s974_s12 = int_to_ptr.vmem [resolvable:$true] %s221_s12 }
  0x1d   : > { %s209_s14 = scalar_lea.sflag [#allocation3], %s961_s5 }
  0x1e   : > { %p653_p5 = pneg %p978_p0 }
  0x21   : > { %s970_s10 = scalar_lea.hbm %s1213_s0, %s562_s7  ;;  %s656_s25 = scalar_lea.hbm %s1213_s0, 256 }
  0x22   : > { %s651_s24 = scalar_lea.hbm %s970_s10, 128  ;;  %p657_p4 = scmp.lt.u32.totalorder %s970_s10, %s1213_s0 }
  0x23   : > { %p652_p3 = scmp.ne.s32.totalorder %s970_s10, %s651_s24  ;;  %p658_p10 = scmp.lt.u32.totalorder %s656_s25, %s651_s24 }
  0x24   : > { %p660_p12 = scmp.lt.u32.totalorder %s651_s24, %s970_s10 }
  0x25   : > { %p654_p6 = pnand %p653_p5, %p652_p3  ;;  %p659_p13 = por %p658_p10, %p657_p4 }
  0x27   : > { %p655_p7 = pneg %p654_p6  ;;  %p661_p1 = por %p660_p12, %p659_p13 }
  0x29   : > { %p662_p2 = pnand %p661_p1, %p655_p7 }
  0x2b   : > { %665 = shalt.err (!%p662_p2)
}
  0x2c   : > { %s666_s22 = scalar_lea.vmem %s974_s12, 128  ;;  %s859_s26 = smov [#allocation2]  }
  0x2d   : > { %p667_p3 = scmp.ne.s32.totalorder %s974_s12, %s666_s22  ;;  %s671_s8 = sshll.u32 %s859_s26, 4  ;;  %s672_s8 = int_to_ptr.vmem [resolvable:$false] %s671_s8 }
  0x2e   : > { %s673_s9 = scalar_lea.vmem %s672_s8, 256  ;;  %p674_p9 = scmp.lt.s32.totalorder %s974_s12, %s672_s8 }
  0x2f   : > { %p669_p6 = pnand %p667_p3, %p653_p5  ;;  %p675_p4 = scmp.lt.s32.totalorder %s673_s9, %s666_s22 }
  0x31   : > { %p670_p11 = pneg %p669_p6  ;;  %p676_p10 = por %p675_p4, %p674_p9 }
  0x33   : > { %p677_p12 = pnand %p676_p10, %p670_p11 }
  0x35   : > { %680 = shalt.err (!%p677_p12)
}
  0x36   : > { %586 = dma.hbm_to_vmem [thread:$0]  (!%p978_p0), %s970_s10, 128, %s974_s12, %s209_s14  }
  0x37   : > { %p1215_p1 = scmp.lt.s32.totalorder %s857_s20, 3  ;;  %p1216_p2 = scmp.ge.s32.totalorder %s857_s20, 1 }
  0x38   : > { %s1023_s11 = scalar_lea.hbm %s1201_s1, %s562_s7  ;;  %s232_s26 = scalar_lea.vmem [#allocation5], %s561_s6 }
  0x39   : > { %p1014_p7 = pnand %p1216_p2, %p1215_p1  ;;  %s241_s8 = sshll.u32 %s232_s26, 4  ;;  %s242_s8 = int_to_ptr.vmem [resolvable:$true] %s241_s8 }
  0x3a   : > { %s229_s10 = scalar_lea.sflag [#allocation6], %s961_s5  ;;  %s681_s12 = scalar_lea.hbm %s1023_s11, 128 }
  0x3b   : > { %s1217_s24 = scalar_select %p1014_p7, 1, 0 }
  0x3c   : > { %p682_p9 = scmp.ne.s32.totalorder %s1023_s11, %s681_s12  ;;  %s686_s7 = scalar_lea.hbm %s1201_s1, 256 }
  0x3d   : > { %p687_p3 = scmp.lt.u32.totalorder %s1023_s11, %s1201_s1  ;;  %p688_p6 = scmp.lt.u32.totalorder %s686_s7, %s681_s12 }
  0x3e   : > { %p684_p11 = pnand %p682_p9, %p653_p5  ;;  %p690_p10 = scmp.lt.u32.totalorder %s681_s12, %s1023_s11 }
  0x3f   : > { %p689_p4 = por %p688_p6, %p687_p3 }
  0x40   : > { %p685_p13 = pneg %p684_p11 }
  0x41   : > { %p691_p12 = por %p690_p10, %p689_p4 }
  0x43   : > { %p692_p1 = pnand %p691_p12, %p685_p13 }
  0x45   : > { %695 = shalt.err (!%p692_p1)
}
  0x46   : > { %s696_s5 = scalar_lea.vmem %s242_s8, 128  ;;  %s860_s6 = smov [#allocation5]  }
  0x47   : > { %p697_p2 = scmp.ne.s32.totalorder %s242_s8, %s696_s5  ;;  %s701_s26 = sshll.u32 %s860_s6, 4  ;;  %s702_s26 = int_to_ptr.vmem [resolvable:$false] %s701_s26 }
  0x48   : > { %s703_s14 = scalar_lea.vmem %s702_s26, 256  ;;  %p704_p8 = scmp.lt.s32.totalorder %s242_s8, %s702_s26 }
  0x49   : > { %p699_p9 = pnand %p697_p2, %p653_p5  ;;  %p705_p7 = scmp.lt.s32.totalorder %s703_s14, %s696_s5 }
  0x4b   : > { %p700_p11 = pneg %p699_p9  ;;  %p706_p3 = por %p705_p7, %p704_p8 }
  0x4d   : > { %p707_p6 = pnand %p706_p3, %p700_p11 }
  0x4f   : > { %710 = shalt.err (!%p707_p6)
}
  0x50   : > { %589 = dma.hbm_to_vmem [thread:$0]  (!%p978_p0), %s1023_s11, 128, %s242_s8, %s229_s10  }
  0x51   : > { %p1218_p13 = scmp.ne.s32.totalorder %s1217_s24, 0 }
  0x52   : > { %s1050_s12 = sand.u32 (!%p1218_p13), 1, %s841_s16   ;;  %p1219_p5 = scmp.ne.s32.totalorder (!%p1218_p13), %s1210_s27, 0 }
  0x53   : > { %250 = sbr.rel (%p1218_p13) target bundleno = 173 (0xad), region = 28  ;;  %s566_s9 = sshll.u32 (!%p1218_p13), %s1050_s12, 3 }
  0x54   : > { %s253_s7 = scalar_lea.sflag (!%p1218_p13), [#allocation3], %s1050_s12  ;;  %s256_s22 = scalar_lea.vmem (!%p1218_p13), [#allocation2], %s566_s9 }
  0x5a   : > { %820 = dma.done.wait (%p1219_p5), %s253_s7, 128  }
  0x5b   : > { %822 = vsyncadd (%p1219_p5), %s253_s7, 4294967168  ;;  %s262_s13 = scalar_lea.sflag [#allocation6], %s1050_s12  ;;  %s265_s11 = scalar_lea.vmem [#allocation5], %s566_s9 }
  0x5c   : > { %824 = dma.done.wait (%p1219_p5), %s262_s13, 128  }
  0x5d   : > { %826 = vsyncadd (%p1219_p5), %s262_s13, 4294967168  ;;  %s1064_s24 = scalar_lea.vmem [#allocation8], %s1050_s12  ;;  %v861_v0 = vmov 0.0   ;;  %s1068_s8 = scalar_lea.vmem [#allocation7], %s1050_s12  ;;  %v311_v1 = vld [vmem:[%s256_s22] sm:$0xff]  ;;  %v312_v2 = vld [vmem:[%s265_s11] sm:$0xff] }
  0x5e   : > { %309 = vst [vmem:[%s1064_s24] sm:$0x1] %v861_v0  ;;  %308 = vst [vmem:[%s1068_s8] sm:$0x1] %v861_v0  ;;  %s1072_s10 = scalar_lea.vmem [#allocation10], %s1050_s12  ;;  %v324_v3 = vrot.slane %v311_v1, 4  ;;  %v314_v4 = vmul.f32 %v312_v2, %v311_v1  ;;  %v333_v5 = vrot.slane %v312_v2, 4  ;;  %s345_s27 = sand.u32 1, %s921_s21  }
  0x5f   : > { %310 = vst [vmem:[%s1072_s10] sm:$0x1] %v861_v0  ;;  %s394_s25 = sshll.u32 %s1072_s10, 4  ;;  %s568_s5 = sshll.u32 %s849_s18, 4  ;;  %s1081_s25 = int_to_ptr.vmem [resolvable:$true] %s394_s25 }
  0x60   : > { %v325_v6 = vadd.f32 %v324_v3, %v311_v1  ;;  %v315_v7 = vrot.slane %v314_v4, 4  ;;  %v334_v8 = vadd.f32 %v333_v5, %v312_v2  ;;  %s379_s6 = sshll.u32 %s1064_s24, 4  ;;  %s364_s26 = sshll.u32 %s1068_s8, 4  ;;  %s1090_s6 = int_to_ptr.vmem [resolvable:$true] %s379_s6  ;;  %s1104_s26 = int_to_ptr.vmem [resolvable:$true] %s364_s26 }
  0x61   : > { %s1088_s9 = scalar_lea.hbm %s1203_s3, %s568_s5  ;;  %s1095_s22 = scalar_lea.hbm %s1204_s4, %s568_s5 }
  0x62   : > { %v326_v9 = vrot.slane %v325_v6, 2  ;;  %v316_v10 = vadd.f32 %v315_v7, %v314_v4  ;;  %v335_v11 = vrot.slane %v334_v8, 2  ;;  %s1102_s0 = scalar_lea.hbm %s1202_s2, %s568_s5  ;;  %s1106_s21 = scalar_lea.sflag [#allocation9], %s345_s27 }
  0x63   : > { %s711_s14 = scalar_lea.vmem %s1090_s6, 16  ;;  %p1220_p0 = scmp.ne.s32.totalorder %s1211_s28, 0 }
  0x64   : > { %v327_v12 = vadd.f32 %v326_v9, %v325_v6  ;;  %v317_v13 = vrot.slane %v316_v10, 2  ;;  %v336_v14 = vadd.f32 %v335_v11, %v334_v8  ;;  %p712_p8 = scmp.ne.s32.totalorder %s1090_s6, %s711_s14  ;;  %s862_s18 = smov [#allocation8]  }
  0x65   : > { %v323_v18 = vld [vmem:[%s1064_s24] sm:$0x1]  ;;  %s715_s7 = sshll.u32 %s862_s18, 4  ;;  %s716_s7 = int_to_ptr.vmem [resolvable:$false] %s715_s7 }
  0x66   : > { %v328_v15 = vrot.slane %v327_v12, 1  ;;  %v318_v16 = vadd.f32 %v317_v13, %v316_v10  ;;  %v337_v17 = vrot.slane %v336_v14, 1  ;;  %v332_v19 = vld [vmem:[%s1072_s10] sm:$0x1]  ;;  %p713_p7 = pnand %p712_p8, %p1220_p0  ;;  %p718_p10 = scmp.lt.s32.totalorder %s1090_s6, %s716_s7 }
  0x67   : > { %v313_v23 = vld [vmem:[%s1068_s8] sm:$0x1] }
  0x68   : > { %v329_v20 = vadd.f32 %v328_v15, %v327_v12  ;;  %v319_v21 = vrot.slane %v318_v16, 1  ;;  %v338_v22 = vadd.f32 %v337_v17, %v336_v14  ;;  %p714_p4 = pneg %p713_p7 }
  0x6a   : > { %v330_v24 = vadd.f32 %v329_v20, %v323_v18  ;;  %v320_v25 = vadd.f32 %v319_v21, %v318_v16  ;;  %v339_v26 = vadd.f32 %v338_v22, %v332_v19 }
  0x6c   : > { %331 = vst [vmem:[%s1064_s24] sm:$0x1] %v330_v24  ;;  %v321_v27 = vadd.f32 %v320_v25, %v313_v23  ;;  %340 = vst [vmem:[%s1072_s10] sm:$0x1] %v339_v26  ;;  %s717_s24 = scalar_lea.vmem %s716_s7, 32 }
  0x6d   : > { %p719_p12 = scmp.lt.s32.totalorder %s717_s24, %s711_s14 }
  0x6f   : > { %p720_p1 = por %p719_p12, %p718_p10 }
  0x71   : > { %p721_p2 = pnand %p720_p1, %p714_p4 }
  0x73   : > { %724 = shalt.err (!%p721_p2)
}
  0x74   : > { %s725_s10 = scalar_lea.hbm %s1088_s9, 16  ;;  %s729_s13 = scalar_lea.hbm %s1203_s3, 32 }
  0x75   : > { %p726_p9 = scmp.ne.s32.totalorder %s1088_s9, %s725_s10  ;;  %p730_p6 = scmp.lt.u32.totalorder %s1088_s9, %s1203_s3 }
  0x76   : > { %p731_p13 = scmp.lt.u32.totalorder %s729_s13, %s725_s10  ;;  %p733_p8 = scmp.lt.u32.totalorder %s725_s10, %s1088_s9 }
  0x77   : > { %p727_p11 = pnand %p726_p9, %p1220_p0 }
  0x78   : > { %p732_p5 = por %p731_p13, %p730_p6 }
  0x79   : > { %p728_p3 = pneg %p727_p11 }
  0x7a   : > { %p734_p7 = por %p733_p8, %p732_p5 }
  0x7c   : > { %p735_p4 = pnand %p734_p7, %p728_p3 }
  0x7e   : > { %738 = shalt.err (!%p735_p4)
}
  0x7f   : > { %578 = dma.vmem_to_hbm [thread:$0]  (%p1220_p0), %s1090_s6, 16, %s1088_s9, %s1106_s21   ;;  %322 = vst [vmem:[%s1068_s8] sm:$0x1] %v321_v27 }
  0x80   : > { %s739_s14 = scalar_lea.vmem %s1081_s25, 16  ;;  %s863_s7 = smov [#allocation10]  }
  0x81   : > { %p740_p10 = scmp.ne.s32.totalorder %s1081_s25, %s739_s14  ;;  %s743_s24 = sshll.u32 %s863_s7, 4  ;;  %s744_s24 = int_to_ptr.vmem [resolvable:$false] %s743_s24 }
  0x82   : > { %s745_s10 = scalar_lea.vmem %s744_s24, 32  ;;  %p746_p2 = scmp.lt.s32.totalorder %s1081_s25, %s744_s24 }
  0x83   : > { %p741_p12 = pnand %p740_p10, %p1220_p0  ;;  %p747_p9 = scmp.lt.s32.totalorder %s745_s10, %s739_s14 }
  0x85   : > { %p742_p1 = pneg %p741_p12  ;;  %p748_p11 = por %p747_p9, %p746_p2 }
  0x87   : > { %p749_p3 = pnand %p748_p11, %p742_p1 }
  0x89   : > { %752 = shalt.err (!%p749_p3)
}
  0x8a   : > { %s753_s8 = scalar_lea.hbm %s1095_s22, 16  ;;  %s757_s27 = scalar_lea.hbm %s1204_s4, 32 }
  0x8b   : > { %p754_p6 = scmp.ne.s32.totalorder %s1095_s22, %s753_s8  ;;  %p758_p8 = scmp.lt.u32.totalorder %s1095_s22, %s1204_s4 }
  0x8c   : > { %p759_p7 = scmp.lt.u32.totalorder %s757_s27, %s753_s8  ;;  %p761_p10 = scmp.lt.u32.totalorder %s753_s8, %s1095_s22 }
  0x8d   : > { %p755_p13 = pnand %p754_p6, %p1220_p0 }
  0x8e   : > { %p760_p4 = por %p759_p7, %p758_p8 }
  0x8f   : > { %p756_p5 = pneg %p755_p13 }
  0x90   : > { %p762_p12 = por %p761_p10, %p760_p4 }
  0x92   : > { %p763_p1 = pnand %p762_p12, %p756_p5 }
  0x94   : > { %766 = shalt.err (!%p763_p1)
}
  0x95   : > { %579 = dma.vmem_to_hbm [thread:$0]  (%p1220_p0), %s1081_s25, 16, %s1095_s22, %s1106_s21  }
  0x96   : > { %s342_s11 = scalar_lea.sflag [#allocation4], %s1050_s12  ;;  %s767_s18 = scalar_lea.vmem %s1104_s26, 16 }
  0x97   : > { %p768_p2 = scmp.ne.s32.totalorder %s1104_s26, %s767_s18  ;;  %s864_s14 = smov [#allocation7]  }
  0x98   : > { %s771_s7 = sshll.u32 %s864_s14, 4  ;;  %s772_s7 = int_to_ptr.vmem [resolvable:$false] %s771_s7 }
  0x99   : > { %p769_p9 = pnand %p768_p2, %p1220_p0  ;;  %s773_s24 = scalar_lea.vmem %s772_s7, 32 }
  0x9a   : > { %p774_p3 = scmp.lt.s32.totalorder %s1104_s26, %s772_s7  ;;  %p775_p6 = scmp.lt.s32.totalorder %s773_s24, %s767_s18 }
  0x9b   : > { %p770_p11 = pneg %p769_p9 }
  0x9c   : > { %p776_p13 = por %p775_p6, %p774_p3 }
  0x9e   : > { %p777_p5 = pnand %p776_p13, %p770_p11 }
  0xa0   : > { %780 = shalt.err (!%p777_p5)
}
  0xa1   : > { %s781_s12 = scalar_lea.hbm %s1102_s0, 16  ;;  %s785_s21 = scalar_lea.hbm %s1202_s2, 32 }
  0xa2   : > { %p782_p8 = scmp.ne.s32.totalorder %s1102_s0, %s781_s12  ;;  %p786_p10 = scmp.lt.u32.totalorder %s1102_s0, %s1202_s2 }
  0xa3   : > { %p787_p12 = scmp.lt.u32.totalorder %s785_s21, %s781_s12  ;;  %p789_p2 = scmp.lt.u32.totalorder %s781_s12, %s1102_s0 }
  0xa4   : > { %p783_p7 = pnand %p782_p8, %p1220_p0 }
  0xa5   : > { %p788_p1 = por %p787_p12, %p786_p10 }
  0xa6   : > { %p784_p4 = pneg %p783_p7 }
  0xa7   : > { %p790_p9 = por %p789_p2, %p788_p1 }
  0xa9   : > { %p791_p11 = pnand %p790_p9, %p784_p4 }
  0xab   : > { %794 = shalt.err (!%p791_p11)
}
  0xac   : > { %577 = dma.vmem_to_hbm [thread:$0]  (%p1220_p0), %s1104_s26, 16, %s1102_s0, %s342_s11  }
  0xad PF: > { %s406_s6 = sand.u32 1, %s837_s15   ;;  %p1221_p3 = scmp.ne.s32.totalorder %s1212_s30, 0 }
  0xae   : > { %p1222_p6 = scmp.ge.s32.totalorder %s857_s20, 2  ;;  %s407_s9 = scalar_lea.sflag [#allocation4], %s406_s6 }
  0xb0   : > { %p591_p13 = pnand %p1222_p6, %p1221_p3 }
  0xb2   : > { %828 = dma.done.wait (!%p591_p13), %s407_s9, 16  }
  0xb3   : > { %830 = vsyncadd (!%p591_p13), %s407_s9, 4294967280  ;;  %s1223_s27 = sadd.s32 4294967294, %s857_s20  }
  0xb4   : > { %s414_s5 = sand.u32 1, %s1223_s27  }
  0xb5   : > { %s415_s13 = scalar_lea.sflag [#allocation9], %s414_s5 }
  0xb6   : > { %832 = dma.done.wait (!%p591_p13), %s415_s13, 32  }
  0xb7   : > { %834 = vsyncadd (!%p591_p13), %s415_s13, 4294967264  ;;  %s27_s20 = sadd.s32 1, %s857_s20   ;;  %s1224_s15 = smov %s841_s16 }
  0xb8   : > { %p24_p0 = scmp.ge.s32.totalorder %s27_s20, 4   ;;  %s1225_s16 = smov %s845_s17 }
  0xb9   : > { %s1226_s17 = smov %s952_s29  ;;  %s1227_s18 = smov %s853_s19 }
  0xba   : > { %s1228_s19 = smov %s1230_s23  ;;  %26 = sbr.rel (!%p24_p0) target bundleno = 12 (0xc), region = 122 }
  0xc1   :  { %427 = vsyncpa [#allocation3], 1 }
  0xc2   :  { %429 = vsyncpa [#allocation3 + $0x1], 1 }
  0xc3   :  { %430 = vsyncpa [#allocation6], 1 }
  0xc4   :  { %432 = vsyncpa [#allocation6 + $0x1], 1 }
  0xc5   :  { %433 = vsyncpa [#allocation4], 1 }
  0xc6   :  { %435 = vsyncpa [#allocation4 + $0x1], 1 }
  0xc7   :  { %436 = vsyncpa [#allocation9], 1 }
  0xc8   :  { %438 = vsyncpa [#allocation9 + $0x1], 1 }

</bundles_post_ra>
